<compile_context>
chip_gen: v7x
topology: tpu7x:2x2x1
jax: 0.10.0
libtpu: 0.0.40
codegen_flags: <defaults>
</compile_context>

<pallas_src>
import jax
import jax.numpy as jnp
from jax.experimental import pallas as pl
from jax.experimental.pallas import tpu as pltpu


def _attack_loss_kernel(obj_ref, det_ref, out_ref):
    # obj_ref : (TB, N_OBJ, 8) f32  cols 0..3 = x1,y1,x2,y2 ; col 4 = label
    # det_ref : (TB, 8, N_DET) f32  rows 0..3 = x1,y1,x2,y2 ; row 4 = label
    # out_ref : (1, TB)        f32  loc_loss_all per image in this block
    ob = obj_ref[...]
    de = det_ref[...]

    # Object-side columns (TB, n_obj, 1): broadcast along lanes (detections).
    ox1 = ob[:, :, 0:1]
    oy1 = ob[:, :, 1:2]
    ox2 = ob[:, :, 2:3]
    oy2 = ob[:, :, 3:4]
    olab = ob[:, :, 4:5]

    # Detection-side rows (TB, 1, n_det): broadcast along sublanes (objects).
    dx1 = de[:, 0:1, :]
    dy1 = de[:, 1:2, :]
    dx2 = de[:, 2:3, :]
    dy2 = de[:, 3:4, :]
    dlab = de[:, 4:5, :]

    # Fused pairwise intersection (TB, n_obj, n_det): no ix/iy temporaries.
    iw = jnp.maximum(jnp.minimum(ox2, dx2) - jnp.maximum(ox1, dx1), 0.0)
    ih = jnp.maximum(jnp.minimum(oy2, dy2) - jnp.maximum(oy1, dy1), 0.0)
    inter = iw * ih

    union = (ox2 - ox1) * (oy2 - oy1) + (dx2 - dx1) * (dy2 - dy1) - inter
    # Approx reciprocal runs on the EUP (free slot vs. a VALU divide refine).
    # Note: degenerate zero-area pairs give union == 0 -> inf -> 0*inf = NaN,
    # same 0/0 hazard as the exact-division reference / PyTorch original.
    iou = inter * pl.reciprocal(union, approx=True)

    # Only detections with the same class label count; mask the rest to -1.
    masked_iou = jnp.where(olab == dlab, iou, -1.0)

    # Best matching-label IoU per object (equivalent to the sorted scan +
    # first-label-match in the reference, since occupancy is never updated).
    row_max = jnp.max(masked_iou, axis=-1)          # (TB, n_obj)
    valid = row_max >= 0.0                           # object had a match

    num = jnp.sum(jnp.where(valid, 1.0 - row_max, 0.0),
                  axis=-1, keepdims=True)            # (TB, 1)
    den = jnp.sum(valid.astype(jnp.float32),
                  axis=-1, keepdims=True)            # (TB, 1)
    # If an image has no matching-label detection at all, den == 0 and the
    # per-image result is NaN/Inf — same hazard as the original PyTorch code.
    loss_col = num / den                             # (TB, 1)

    # Lane-dense store: one (1, TB) row per grid step (tiny XLU transpose).
    out_ref[...] = loss_col.reshape(1, -1)


@jax.jit
def attack_loss_batched(boxes, det_boxes, labels, det_labels):
    """Per-image attack localization loss.

    boxes:      (B, n_obj, 4) f32 ground-truth boundary boxes
    det_boxes:  (B, n_det, 4) f32 detected boundary boxes
    labels:     (B, n_obj)    i32 ground-truth labels
    det_labels: (B, n_det)    i32 detected labels
    returns:    (B,) f32 loc_loss_all per image
    """
    B, n_obj, _ = boxes.shape
    n_det = det_boxes.shape[1]

    # Block-batch size: fold up to 8 images per grid step, but keep >= 2 grid
    # steps whenever B >= 2 so both v7x TensorCores get work ("parallel").
    TB = max(1, min(8, -(-B // 2)))
    num_steps = -(-B // TB)
    B_pad = num_steps * TB

    # --- Layout prep inside the same jitted program (no standalone dispatch).
    # Pack label as a 5th channel (f32 is exact for small class ids) so the
    # kernel receives only two operands -> half the per-step input DMAs.
    f32 = jnp.float32
    obj_packed = jnp.concatenate(
        [boxes.astype(f32),
         labels.astype(f32).reshape(B, n_obj, 1),
         jnp.zeros((B, n_obj, 3), f32)], axis=2)                 # (B, n_obj, 8)
    det_packed = jnp.concatenate(
        [jnp.swapaxes(det_boxes.astype(f32), 1, 2),              # (B, 4, n_det)
         det_labels.astype(f32).reshape(B, 1, n_det),
         jnp.zeros((B, 3, n_det), f32)], axis=1)                 # (B, 8, n_det)

    if B_pad != B:
        pad = B_pad - B
        obj_packed = jnp.concatenate(
            [obj_packed, jnp.zeros((pad, n_obj, 8), f32)], axis=0)
        det_packed = jnp.concatenate(
            [det_packed, jnp.zeros((pad, 8, n_det), f32)], axis=0)

    out = pl.pallas_call(
        _attack_loss_kernel,
        out_shape=jax.ShapeDtypeStruct((num_steps, 1, TB), jnp.float32),
        grid=(num_steps,),
        in_specs=[
            pl.BlockSpec((TB, n_obj, 8), lambda s: (s, 0, 0)),
            pl.BlockSpec((TB, 8, n_det), lambda s: (s, 0, 0)),
        ],
        out_specs=pl.BlockSpec((None, 1, TB), lambda s: (s, 0, 0)),
        compiler_params=pltpu.CompilerParams(
            dimension_semantics=("parallel",)),   # megacore shards steps
    )(obj_packed, det_packed)

    return out.reshape(B_pad)[:B]


def attack_loss(boxes, det_boxes, labels, det_labels):
    """Module-equivalent forward(): the original only processes batch 0."""
    return attack_loss_batched(boxes, det_boxes, labels, det_labels)[0]


def _reference_batched(boxes, det_boxes, labels, det_labels):
    """Pure-JAX reference of the same semantics (exact division)."""
    ox1 = boxes[..., 0][:, :, None]
    oy1 = boxes[..., 1][:, :, None]
    ox2 = boxes[..., 2][:, :, None]
    oy2 = boxes[..., 3][:, :, None]
    dx1 = det_boxes[..., 0][:, None, :]
    dy1 = det_boxes[..., 1][:, None, :]
    dx2 = det_boxes[..., 2][:, None, :]
    dy2 = det_boxes[..., 3][:, None, :]
    iw = jnp.maximum(jnp.minimum(ox2, dx2) - jnp.maximum(ox1, dx1), 0.0)
    ih = jnp.maximum(jnp.minimum(oy2, dy2) - jnp.maximum(oy1, dy1), 0.0)
    inter = iw * ih
    union = (ox2 - ox1) * (oy2 - oy1) + (dx2 - dx1) * (dy2 - dy1) - inter
    iou = inter / union
    match = labels[:, :, None] == det_labels[:, None, :]
    masked = jnp.where(match, iou, -1.0)
    row_max = jnp.max(masked, axis=-1)                 # (B, n_obj)
    valid = row_max >= 0.0
    num = jnp.sum(jnp.where(valid, 1.0 - row_max, 0.0), axis=-1)
    den = jnp.sum(valid.astype(jnp.float32), axis=-1)
    return num / den


if __name__ == "__main__":
    key = jax.random.PRNGKey(0)
    k1, k2, k3, k4, k5, k6 = jax.random.split(key, 6)

    B = 16         # images; TB=8 -> 2 parallel grid steps (feeds both v7x TCs)
    N_OBJ = 8      # ground-truth objects per image
    N_DET = 128    # detections per image
    N_CLS = 3      # classes (stand-in for len(label_map) - background)

    # Ground-truth boxes in boundary coords (x1 < x2, y1 < y2) inside [0, 1].
    o_xy = jax.random.uniform(k1, (B, N_OBJ, 2), minval=0.0, maxval=0.6)
    o_wh = jax.random.uniform(k2, (B, N_OBJ, 2), minval=0.1, maxval=0.4)
    boxes = jnp.concatenate([o_xy, o_xy + o_wh], axis=-1).astype(jnp.float32)

    # Detected boxes.
    d_xy = jax.random.uniform(k3, (B, N_DET, 2), minval=0.0, maxval=0.6)
    d_wh = jax.random.uniform(k4, (B, N_DET, 2), minval=0.1, maxval=0.4)
    det_boxes = jnp.concatenate([d_xy, d_xy + d_wh], axis=-1).astype(jnp.float32)

    # Labels in {1, ..., N_CLS}; force every class to appear among detections
    # so every object has at least one matching-label detection (the original
    # code implicitly assumes this when dividing by len(loc_loss)).
    labels = jax.random.randint(k5, (B, N_OBJ), 1, N_CLS + 1, dtype=jnp.int32)
    det_labels = jax.random.randint(k6, (B, N_DET), 1, N_CLS + 1,
                                    dtype=jnp.int32)
    det_labels = det_labels.at[:, :N_CLS].set(
        jnp.arange(1, N_CLS + 1, dtype=jnp.int32)[None, :])

    losses = attack_loss_batched(boxes, det_boxes, labels, det_labels)
    jax.block_until_ready(losses)
    loss0 = losses[0]   # == original module's forward() output (batch 0 only)

    ref = _reference_batched(boxes, det_boxes, labels, det_labels)
    # Tolerance loosened to cover the approx-reciprocal (~2^-12 rel error).
    assert jnp.allclose(losses, ref, rtol=2e-3, atol=2e-3), (losses, ref)
    assert bool(jnp.isfinite(loss0))

    # TODO(synk): det_scores / con_loss_all are computed but discarded by the
    # original forward() (only loc_loss_all is returned), so they are omitted.
    print("KERNEL_OK")
</pallas_src>

<mosaic_0001>
module attributes {stable_mosaic.version = 11 : i64} {
  func.func @_attack_loss_kernel(%arg0: i32, %arg1: memref<8x8x8xf32, #tpu.memory_space<vmem>>, %arg2: memref<8x8x128xf32, #tpu.memory_space<vmem>>, %arg3: memref<1x1x8xf32, #tpu.memory_space<vmem>>) attributes {dimension_semantics = [#tpu.dimension_semantics<parallel>], iteration_bounds = array<i64: 2>, scalar_prefetch = 0 : i64, scratch_operands = 0 : i64, tpu.core_type = #tpu.core_type<tc>, window_params = [{transform_indices = @transform_0, window_bounds = array<i64: 8, 8, 8>}, {transform_indices = @transform_1, window_bounds = array<i64: 8, 8, 128>}, {transform_indices = @transform_2, window_bounds = array<i64: 1, 1, 8>}]} {
    %c0 = arith.constant 0 : index
    %c0_0 = arith.constant 0 : index
    %c0_1 = arith.constant 0 : index
    %0 = vector.load %arg1[%c0, %c0_0, %c0_1] : memref<8x8x8xf32, #tpu.memory_space<vmem>>, vector<8x8x8xf32>
    %c0_2 = arith.constant 0 : index
    %c0_3 = arith.constant 0 : index
    %c0_4 = arith.constant 0 : index
    %1 = vector.load %arg2[%c0_2, %c0_3, %c0_4] : memref<8x8x128xf32, #tpu.memory_space<vmem>>, vector<8x8x128xf32>
    %2 = vector.extract_strided_slice %0 {offsets = [0, 0, 0], sizes = [8, 8, 1], strides = [1, 1, 1]} : vector<8x8x8xf32> to vector<8x8x1xf32>
    %3 = vector.extract_strided_slice %0 {offsets = [0, 0, 1], sizes = [8, 8, 1], strides = [1, 1, 1]} : vector<8x8x8xf32> to vector<8x8x1xf32>
    %4 = vector.extract_strided_slice %0 {offsets = [0, 0, 2], sizes = [8, 8, 1], strides = [1, 1, 1]} : vector<8x8x8xf32> to vector<8x8x1xf32>
    %5 = vector.extract_strided_slice %0 {offsets = [0, 0, 3], sizes = [8, 8, 1], strides = [1, 1, 1]} : vector<8x8x8xf32> to vector<8x8x1xf32>
    %6 = vector.extract_strided_slice %0 {offsets = [0, 0, 4], sizes = [8, 8, 1], strides = [1, 1, 1]} : vector<8x8x8xf32> to vector<8x8x1xf32>
    %7 = vector.extract_strided_slice %1 {offsets = [0, 0, 0], sizes = [8, 1, 128], strides = [1, 1, 1]} : vector<8x8x128xf32> to vector<8x1x128xf32>
    %8 = vector.extract_strided_slice %1 {offsets = [0, 1, 0], sizes = [8, 1, 128], strides = [1, 1, 1]} : vector<8x8x128xf32> to vector<8x1x128xf32>
    %9 = vector.extract_strided_slice %1 {offsets = [0, 2, 0], sizes = [8, 1, 128], strides = [1, 1, 1]} : vector<8x8x128xf32> to vector<8x1x128xf32>
    %10 = vector.extract_strided_slice %1 {offsets = [0, 3, 0], sizes = [8, 1, 128], strides = [1, 1, 1]} : vector<8x8x128xf32> to vector<8x1x128xf32>
    %11 = vector.extract_strided_slice %1 {offsets = [0, 4, 0], sizes = [8, 1, 128], strides = [1, 1, 1]} : vector<8x8x128xf32> to vector<8x1x128xf32>
    %12 = vector.broadcast %4 : vector<8x8x1xf32> to vector<8x8x128xf32>
    %13 = vector.broadcast %9 : vector<8x1x128xf32> to vector<8x8x128xf32>
    %14 = arith.minimumf %12, %13 : vector<8x8x128xf32>
    %15 = vector.broadcast %2 : vector<8x8x1xf32> to vector<8x8x128xf32>
    %16 = vector.broadcast %7 : vector<8x1x128xf32> to vector<8x8x128xf32>
    %17 = arith.maximumf %15, %16 : vector<8x8x128xf32>
    %18 = arith.subf %14, %17 : vector<8x8x128xf32>
    %cst = arith.constant 0.000000e+00 : f32
    %19 = vector.broadcast %cst : f32 to vector<8x8x128xf32>
    %20 = arith.maximumf %18, %19 : vector<8x8x128xf32>
    %21 = vector.broadcast %5 : vector<8x8x1xf32> to vector<8x8x128xf32>
    %22 = vector.broadcast %10 : vector<8x1x128xf32> to vector<8x8x128xf32>
    %23 = arith.minimumf %21, %22 : vector<8x8x128xf32>
    %24 = vector.broadcast %3 : vector<8x8x1xf32> to vector<8x8x128xf32>
    %25 = vector.broadcast %8 : vector<8x1x128xf32> to vector<8x8x128xf32>
    %26 = arith.maximumf %24, %25 : vector<8x8x128xf32>
    %27 = arith.subf %23, %26 : vector<8x8x128xf32>
    %cst_5 = arith.constant 0.000000e+00 : f32
    %28 = vector.broadcast %cst_5 : f32 to vector<8x8x128xf32>
    %29 = arith.maximumf %27, %28 : vector<8x8x128xf32>
    %30 = arith.mulf %20, %29 : vector<8x8x128xf32>
    %31 = arith.subf %4, %2 : vector<8x8x1xf32>
    %32 = arith.subf %5, %3 : vector<8x8x1xf32>
    %33 = arith.mulf %31, %32 : vector<8x8x1xf32>
    %34 = arith.subf %9, %7 : vector<8x1x128xf32>
    %35 = arith.subf %10, %8 : vector<8x1x128xf32>
    %36 = arith.mulf %34, %35 : vector<8x1x128xf32>
    %37 = vector.broadcast %33 : vector<8x8x1xf32> to vector<8x8x128xf32>
    %38 = vector.broadcast %36 : vector<8x1x128xf32> to vector<8x8x128xf32>
    %39 = arith.addf %37, %38 : vector<8x8x128xf32>
    %40 = arith.subf %39, %30 : vector<8x8x128xf32>
    %41 = tpu.reciprocal %40 {approx = true} : vector<8x8x128xf32> -> vector<8x8x128xf32>
    %42 = arith.mulf %30, %41 : vector<8x8x128xf32>
    %43 = vector.broadcast %6 : vector<8x8x1xf32> to vector<8x8x128xf32>
    %44 = vector.broadcast %11 : vector<8x1x128xf32> to vector<8x8x128xf32>
    %45 = arith.cmpf oeq, %43, %44 : vector<8x8x128xf32>
    %cst_6 = arith.constant -1.000000e+00 : f32
    %46 = vector.broadcast %cst_6 : f32 to vector<8x8x128xf32>
    %47 = arith.select %45, %42, %46 : vector<8x8x128xi1>, vector<8x8x128xf32>
    %cst_7 = arith.constant dense<0xFF800000> : vector<8x8xf32>
    %48 = vector.multi_reduction <maximumf>, %47, %cst_7 [2] : vector<8x8x128xf32> to vector<8x8xf32>
    %cst_8 = arith.constant 0.000000e+00 : f32
    %49 = vector.broadcast %cst_8 : f32 to vector<8x8xf32>
    %50 = arith.cmpf oge, %48, %49 : vector<8x8xf32>
    %cst_9 = arith.constant 1.000000e+00 : f32
    %51 = vector.broadcast %cst_9 : f32 to vector<8x8xf32>
    %52 = arith.subf %51, %48 : vector<8x8xf32>
    %cst_10 = arith.constant 0.000000e+00 : f32
    %53 = vector.broadcast %cst_10 : f32 to vector<8x8xf32>
    %54 = arith.select %50, %52, %53 : vector<8x8xi1>, vector<8x8xf32>
    %cst_11 = arith.constant dense<0.000000e+00> : vector<8xf32>
    %55 = vector.multi_reduction <add>, %54, %cst_11 [1] : vector<8x8xf32> to vector<8xf32>
    %56 = vector.shape_cast %55 : vector<8xf32> to vector<8x1xf32>
    %57 = arith.extui %50 : vector<8x8xi1> to vector<8x8xi32>
    %58 = arith.sitofp %57 : vector<8x8xi32> to vector<8x8xf32>
    %cst_12 = arith.constant dense<0.000000e+00> : vector<8xf32>
    %59 = vector.multi_reduction <add>, %58, %cst_12 [1] : vector<8x8xf32> to vector<8xf32>
    %60 = vector.shape_cast %59 : vector<8xf32> to vector<8x1xf32>
    %61 = arith.divf %56, %60 : vector<8x1xf32>
    %62 = vector.shape_cast %61 : vector<8x1xf32> to vector<1x8xf32>
    %c0_13 = arith.constant 0 : index
    %c0_14 = arith.constant 0 : index
    %c0_15 = arith.constant 0 : index
    %63 = vector.load %arg3[%c0_13, %c0_14, %c0_15] : memref<1x1x8xf32, #tpu.memory_space<vmem>>, vector<1x1x8xf32>
    %64 = vector.shape_cast %63 : vector<1x1x8xf32> to vector<1x8xf32>
    %65 = vector.shape_cast %62 : vector<1x8xf32> to vector<1x1x8xf32>
    tpu.vector_store %arg3[%c0_13, %c0_14, %c0_15], %65 {strides = array<i32>} : memref<1x1x8xf32, #tpu.memory_space<vmem>>, vector<1x1x8xf32>,
    return
  }
  func.func @transform_0(%arg0: i32) -> (i32, i32, i32) {
    %c0_i32 = arith.constant 0 : i32
    %c0_i32_0 = arith.constant 0 : i32
    %c0_i32_1 = arith.constant 0 : i32
    return %arg0, %c0_i32, %c0_i32_0 : i32, i32, i32
  }
  func.func @transform_1(%arg0: i32) -> (i32, i32, i32) {
    %c0_i32 = arith.constant 0 : i32
    %c0_i32_0 = arith.constant 0 : i32
    %c0_i32_1 = arith.constant 0 : i32
    return %arg0, %c0_i32, %c0_i32_0 : i32, i32, i32
  }
  func.func @transform_2(%arg0: i32) -> (i32, i32, i32) {
    %c0_i32 = arith.constant 0 : i32
    %c0_i32_0 = arith.constant 0 : i32
    %c0_i32_1 = arith.constant 0 : i32
    return %arg0, %c0_i32, %c0_i32_0 : i32, i32, i32
  }
}

</mosaic_0001>

<bundles_post_ra>
// kernel: attack_loss_batched.1
= control target key start
LH: loop header
LB: loop body
LE: loop exit
PB: predicated region body
PF: predicated region fallthrough
CT: control target
= control target key end

     0   :  { %s1184_s9 = smov 0   ;;  %s1575_s0 = inlined_call_operand.vmem [shape: f32[16,8,8], index: 0, kind: input, shape index: {}]   ;;  %s1576_s1 = inlined_call_operand.vmem [shape: f32[16,8,128], index: 1, kind: input, shape index: {}]   ;;  %s1577_s2 = inlined_call_operand.vmem [shape: f32[2,1,8], index: 2, kind: output, shape index: {}]  }
   0x1 LB: > { %s1190_s10 = sadd.s32 4294967295, %s1159_s9   ;;  %p1077_p0 = scmp.ge.s32.totalorder %s1159_s9, 1  ;;  %s1159_s9 = sphi %s1184_s9, %s12_s9  }
   0x2   : > { %p124_p1 = scmp.lt.s32.totalorder %s1159_s9, 3 }
   0x4   : > { %p125_p2 = pnand %p1077_p0, %p124_p1 }
   0x5   : > { %s1078_s11 = sshll.u32 (!%p125_p2), %s1190_s10, 3  ;;  %v1161_v0 = vmov (!%p125_p2), 2   ;;  %v1162_v1 = vmov (!%p125_p2), 0   ;;  %s1163_s16 = smov (!%p125_p2), 2   ;;  %v1164_v10 = vmov (!%p125_p2), 3   ;;  %v1165_v11 = vmov (!%p125_p2), 1  }
   0x6   : > { %128 = sbr.rel (%p125_p2) target bundleno = 721 (0x2d1), region = 28  ;;  %p150_p3 = scmp.lt.s32.totalorder (!%p125_p2), %s1078_s11, 15  ;;  %1108 = vset.pattern.permute.xlu1 (!%p125_p2), %v1161_v0  ;;  %1110 = vset.pattern.permute.xlu0 (!%p125_p2), %v1162_v1  ;;  %v220_v27 = vlaneseq (!%p125_p2)  ;;  %vm918_vm10 = vcmask (!%p125_p2), 1041409   ;;  %vm920_vm11 = vcmask (!%p125_p2), 1042434   ;;  %vm922_vm12 = vcmask (!%p125_p2), 1043459  }
   0x7   : > { %s1166_s17 = smov (!%p125_p2), 127   ;;  %vm924_vm14 = vcmask (!%p125_p2), 1044484   ;;  %p161_p4 = scmp.lt.s32.totalorder (!%p125_p2), %s1190_s10, 1 }
   0x8   : > { %v1284_v29 = vshrl.u32 (!%p125_p2), %v220_v27, 7 }
   0xa   : > { %v1296_v30 = vsub.s32 (!%p125_p2), 2, %v1284_v29  ;;  %v1299_v31 = vsub.s32 (!%p125_p2), 0, %v1284_v29  ;;  %v1323_v43 = vsub.s32 (!%p125_p2), 3, %v1284_v29  ;;  %v1339_v49 = vsub.s32 (!%p125_p2), 1, %v1284_v29 }
   0xd   : > { %s1579_s11 = smov (!%p150_p3, %s1078_s11), 15  ;;  %s1581_s10 = smov (!%p161_p4, %s1190_s10), 1 }
   0xe   : > { %s1079_s12 = sshll.u32 %s1579_s11, 3  ;;  %s163_s23 = scalar_lea.vmem %s1577_s2, %s1581_s10 }
   0xf   : > { %s153_s15 = scalar_lea.vmem %s1575_s0, %s1079_s12  ;;  %s1293_s20 = scalar_lea.vmem %s1576_s1, %s1079_s12 }
  0x10   : > { %v1205_v2 = vld [vmem:[%s153_s15] sm:$0xff]  ;;  %v1207_v3 = vld [vmem:[%s153_s15 + $0x10] sm:$0xff]  ;;  %v1211_v4 = vld [vmem:[%s153_s15 + $0x8] sm:$0xff] }
  0x11   : > { %516 = vrot.lane.b32.xlu0 %v1205_v2, %s1163_s16  ;;  %520 = vrot.lane.b32.xlu1 %v1207_v3, %s1163_s16  ;;  %v1213_v5 = vld [vmem:[%s153_s15 + $0x18] sm:$0xff]  ;;  %v1217_v6 = vld [vmem:[%s153_s15 + $0x20] sm:$0xff] }
  0x12   : > { %v1219_v7 = vld [vmem:[%s153_s15 + $0x28] sm:$0xff]  ;;  %v1223_v8 = vld [vmem:[%s153_s15 + $0x30] sm:$0xff]  ;;  %v1225_v9 = vld [vmem:[%s153_s15 + $0x38] sm:$0xff] }
  0x13   : > { %v1304_v32 = vld [vmem:[%s1293_s20 + $0x8] sm:$0xff]  ;;  %v1315_v35 = vld [vmem:[%s1293_s20] sm:$0xff]  ;;  %v1347_v53 = vld [vmem:[%s1293_s20 + $0x10] sm:$0xff] }
  0x14   : > { %v227_v33 = vrot.slane %v1304_v32, %v1296_v30  ;;  %v299_v34 = vrot.slane %v1304_v32, %v1299_v31  ;;  %v295_v40 = vrot.slane %v1315_v35, %v1299_v31  ;;  %v383_v45 = vrot.slane %v1315_v35, %v1323_v43 }
  0x15   : > { %518 = vrot.lane.b32.xlu0 %v1211_v4, %s1163_s16  ;;  %522 = vrot.lane.b32.xlu1 %v1213_v5, %s1163_s16  ;;  %v387_v48 = vrot.slane %v1304_v32, %v1323_v43  ;;  %v459_v52 = vrot.slane %v1304_v32, %v1339_v49  ;;  %v303_v55 = vrot.slane %v1347_v53, %v1299_v31 }
  0x16   : > { %v231_v58 = vrot.slane %v1347_v53, %v1296_v30 }
  0x19   : > { %524 = vrot.lane.b32.xlu0 %v1217_v6, %s1163_s16  ;;  %526 = vrot.lane.b32.xlu1 %v1219_v7, %s1163_s16 }
  0x1d   : > { %528 = vrot.lane.b32.xlu0 %v1223_v8, %s1163_s16  ;;  %530 = vrot.lane.b32.xlu1 %v1225_v9, %s1163_s16 }
  0x21   : > { %187 = vperm.xlu1 %1108, %v1211_v4   ;;  %265 = vperm.xlu0 %1110, %v1211_v4  }
  0x25   : > { %1109 = vset.pattern.permute.xlu1 %v1162_v1  ;;  %269 = vperm.xlu0 %1110, %v1207_v3  }
  0x26   : > { %261 = vperm.xlu1 %1109, %v1205_v2  }
  0x2a   : > { %1111 = vset.pattern.permute.xlu1 %v1164_v10 }
  0x2b   : > { %349 = vperm.xlu1 %1111, %v1205_v2  }
  0x2f   : > { %353 = vperm.xlu1 %1111, %v1211_v4  }
  0x33   : > { %1112 = vset.pattern.permute.xlu1 %v1165_v11 }
  0x34   : > { %425 = vperm.xlu1 %1112, %v1211_v4  }
  0x38   : > { %1113 = vset.pattern.permute.xlu1 %v1161_v0 }
  0x39   : > { %192 = vperm.xlu1 %1113, %v1207_v3  }
  0x3d   : > { %1114 = vset.pattern.permute.xlu1 %v1164_v10 }
  0x3e   : > { %357 = vperm.xlu1 %1114, %v1207_v3  }
  0x42   : > { %1115 = vset.pattern.permute.xlu1 %v1165_v11 }
  0x43   : > { %429 = vperm.xlu1 %1115, %v1207_v3  }
  0x47   : > { %1116 = vset.pattern.permute.xlu1 %v1162_v1 }
  0x48   : > { %273 = vperm.xlu1 %1116, %v1213_v5  }
  0x4c   : > { %1117 = vset.pattern.permute.xlu1 %v1164_v10 }
  0x4d   : > { %361 = vperm.xlu1 %1117, %v1213_v5  }
  0x51   : > { %1118 = vset.pattern.permute.xlu1 %v1161_v0 }
  0x52   : > { %202 = vperm.xlu1 %1118, %v1217_v6  }
  0x56   : > { %1119 = vset.pattern.permute.xlu1 %v1162_v1 }
  0x83   : > { %v517_v12 = vpop.permute.xlu0 %516  ;;  %v521_v13 = vpop.permute.xlu1 %520 }
  0x84   : > { %v1253_v14 = vsub.f32 %v1205_v2, %v517_v12  ;;  %v1257_v15 = vsub.f32 %v1207_v3, %v521_v13  ;;  %v391_v13 = vrot.slane %v1347_v53, %v1323_v43 }
  0x86   : > { %556 = vrot.lane.b32.xlu0 %v1253_v14, %s1166_s17 }
  0x87   : > { %v519_v16 = vpop.permute.xlu0 %518  ;;  %v523_v17 = vpop.permute.xlu1 %522 }
  0x88   : > { %v1260_v18 = vsub.f32 %v1211_v4, %v519_v16  ;;  %v1265_v19 = vsub.f32 %v1213_v5, %v523_v17 }
  0x8a   : > { %560 = vrot.lane.b32.xlu0 %v1257_v15, %s1166_s17  ;;  %558 = vrot.lane.b32.xlu1 %v1260_v18, %s1166_s17 }
  0x8b   : > { %v525_v20 = vpop.permute.xlu0 %524  ;;  %v527_v21 = vpop.permute.xlu1 %526 }
  0x8c   : > { %v1268_v22 = vsub.f32 %v1217_v6, %v525_v20  ;;  %v1273_v23 = vsub.f32 %v1219_v7, %v527_v21  ;;  %v463_v21 = vrot.slane %v1347_v53, %v1339_v49 }
  0x8e   : > { %562 = vrot.lane.b32.xlu1 %v1265_v19, %s1166_s17  ;;  %564 = vrot.lane.b32.xlu0 %v1268_v22, %s1166_s17 }
  0x8f   : > { %v529_v24 = vpop.permute.xlu0 %528  ;;  %v531_v25 = vpop.permute.xlu1 %530 }
  0x90   : > { %v1276_v26 = vsub.f32 %v1223_v8, %v529_v24  ;;  %v1281_v28 = vsub.f32 %v1225_v9, %v531_v25  ;;  %v1370_v24 = vld [vmem:[%s1293_s20 + $0x18] sm:$0xff] }
  0x92   : > { %566 = vrot.lane.b32.xlu1 %v1273_v23, %s1166_s17  ;;  %568 = vrot.lane.b32.xlu0 %v1276_v26, %s1166_s17 }
  0x96   : > { %570 = vrot.lane.b32.xlu1 %v1281_v28, %s1166_s17  ;;  %281 = vperm.xlu0 %1110, %v1219_v7  }
  0x9a   : > { %277 = vperm.xlu1 %1119, %v1217_v6   ;;  %1122 = vset.pattern.permute.xlu0 %v1165_v11 }
  0x9b   : > { %421 = vperm.xlu0 %1122, %v1205_v2  }
  0x9e   : > { %1120 = vset.pattern.permute.xlu1 %v1165_v11 }
  0x9f   : > { %437 = vperm.xlu1 %1120, %v1217_v6   ;;  %433 = vperm.xlu0 %1122, %v1213_v5  }
  0xa0   : > { %v188_v36 = vpop.permute.xlu1 %187  ;;  %v266_v37 = vpop.permute.xlu0 %265 }
  0xa1   : > { %v253_v38 = vmin.f32 %v188_v36, %v227_v33  ;;  %v325_v39 = vmax.f32 %v266_v37, %v299_v34  ;;  %v307_v34 = vrot.slane %v1370_v24, %v1299_v31 }
  0xa3   : > { %1121 = vset.pattern.permute.xlu1 %v1161_v0  ;;  %445 = vperm.xlu0 %1122, %v1223_v8   ;;  %v333_v41 = vsub.f32 %v253_v38, %v325_v39 }
  0xa4   : > { %207 = vperm.xlu1 %1121, %v1219_v7   ;;  %v270_v57 = vpop.permute.xlu0 %269 }
  0xa5   : > { %v262_v42 = vpop.permute.xlu1 %261  ;;  %v341_v60 = vmax.f32 %v333_v41, 0.0  ;;  %v326_v61 = vmax.f32 %v270_v57, %v303_v55 }
  0xa6   : > { %v1325_v44 = vmax.f32 %v262_v42, %v295_v40  ;;  %v1384_v42 = vld [vmem:[%s1293_s20 + $0x20] sm:$0xff] }
  0xa7   : > { %1127 = vset.pattern.permute.xlu0 %v1164_v10 }
  0xa8   : > { %1123 = vset.pattern.permute.xlu1 %v1164_v10  ;;  %365 = vperm.xlu0 %1127, %v1217_v6  }
  0xa9   : > { %369 = vperm.xlu1 %1123, %v1219_v7  }
  0xaa   : > { %v350_v46 = vpop.permute.xlu1 %349 }
  0xab   : > { %v1333_v47 = vmin.f32 %v350_v46, %v383_v45 }
  0xac   : > { %377 = vperm.xlu0 %1127, %v1225_v9  }
  0xad   : > { %1124 = vset.pattern.permute.xlu1 %v1165_v11 }
  0xae   : > { %441 = vperm.xlu1 %1124, %v1219_v7   ;;  %v354_v50 = vpop.permute.xlu1 %353 }
  0xaf   : > { %v413_v51 = vmin.f32 %v354_v50, %v387_v48 }
  0xb0   : > { %1130 = vset.pattern.permute.xlu0 %v1161_v0 }
  0xb1   : > { %182 = vperm.xlu0 %1130, %v1205_v2  }
  0xb2   : > { %1125 = vset.pattern.permute.xlu1 %v1162_v1 }
  0xb3   : > { %v426_v54 = vpop.permute.xlu1 %425  ;;  %285 = vperm.xlu1 %1125, %v1223_v8  }
  0xb4   : > { %v485_v56 = vmax.f32 %v426_v54, %v459_v52 }
  0xb5   : > { %197 = vperm.xlu0 %1130, %v1213_v5  }
  0xb6   : > { %v493_v59 = vsub.f32 %v413_v51, %v485_v56 }
  0xb7   : > { %1126 = vset.pattern.permute.xlu1 %v1164_v10 }
  0xb8   : > { %v501_v62 = vmax.f32 %v493_v59, 0.0  ;;  %v193_v63 = vpop.permute.xlu1 %192  ;;  %373 = vperm.xlu1 %1126, %v1223_v8  }
  0xb9   : > { %v254_v12 = vmin.f32 %v193_v63, %v231_v58  ;;  %212 = vperm.xlu0 %1130, %v1223_v8  }
  0xba   : > { %v1362_v16 = vmul.f32 %v501_v62, %v341_v60 }
  0xbb   : > { %v334_v17 = vsub.f32 %v254_v12, %v326_v61  ;;  %v1167_v12 = vmov 4  }
  0xbc   : > { %1128 = vset.pattern.permute.xlu1 %v1161_v0 }
  0xbd   : > { %v358_v20 = vpop.permute.xlu1 %357  ;;  %217 = vperm.xlu1 %1128, %v1225_v9   ;;  %v342_v37 = vmax.f32 %v334_v17, 0.0 }
  0xbe   : > { %v414_v10 = vmin.f32 %v358_v20, %v391_v13 }
  0xc1   : > { %1129 = vset.pattern.permute.xlu1 %v1162_v1  ;;  %v395_v1 = vrot.slane %v1370_v24, %v1323_v43 }
  0xc2   : > { %v430_v25 = vpop.permute.xlu1 %429  ;;  %289 = vperm.xlu1 %1129, %v1225_v9  }
  0xc3   : > { %v486_v33 = vmax.f32 %v430_v25, %v463_v21 }
  0xc5   : > { %v494_v36 = vsub.f32 %v414_v10, %v486_v33  ;;  %v399_v10 = vrot.slane %v1384_v42, %v1323_v43 }
  0xc6   : > { %1131 = vset.pattern.permute.xlu1 %v1165_v11  ;;  %v239_v11 = vrot.slane %v1384_v42, %v1296_v30 }
  0xc7   : > { %v502_v38 = vmax.f32 %v494_v36, 0.0  ;;  %449 = vperm.xlu1 %1131, %v1225_v9   ;;  %v274_v39 = vpop.permute.xlu1 %273 }
  0xc8   : > { %v1377_v40 = vmax.f32 %v274_v39, %v307_v34 }
  0xc9   : > { %v1381_v41 = vmul.f32 %v502_v38, %v342_v37  ;;  %v223_v38 = vrot.slane %v1315_v35, %v1296_v30 }
  0xcb   : > { %1132 = vset.pattern.permute.xlu1 %v1161_v0 }
  0xcc   : > { %v362_v45 = vpop.permute.xlu1 %361 }
  0xcd   : > { %v1387_v46 = vmin.f32 %v362_v45, %v395_v1 }
  0xd1   : > { %v203_v48 = vpop.permute.xlu1 %202 }
  0xd2   : > { %v256_v50 = vmin.f32 %v203_v48, %v239_v11 }
  0xf8   : > { %v557_v51 = vpop.permute.xlu0 %556 }
  0xf9   : > { %v580_v52 = vmul.f32 %v557_v51, %v1253_v14 }
  0xfb   : > { %654 = vperm.xlu1 %1132, %v580_v52  }
  0xfc   : > { %v559_v54 = vpop.permute.xlu1 %558  ;;  %v561_v55 = vpop.permute.xlu0 %560 }
  0xfd   : > { %v581_v56 = vmul.f32 %v559_v54, %v1260_v18  ;;  %v582_v57 = vmul.f32 %v561_v55, %v1257_v15 }
  0xff   : > { %659 = vperm.xlu0 %1130, %v581_v56   ;;  %664 = vperm.xlu1 %1132, %v582_v57  }
 0x100   : > { %v563_v0 = vpop.permute.xlu1 %562  ;;  %v565_v58 = vpop.permute.xlu0 %564 }
 0x101   : > { %v583_v59 = vmul.f32 %v563_v0, %v1265_v19  ;;  %v584_v60 = vmul.f32 %v565_v58, %v1268_v22  ;;  %v311_v22 = vrot.slane %v1384_v42, %v1299_v31 }
 0x103   : > { %669 = vperm.xlu1 %1132, %v583_v59   ;;  %674 = vperm.xlu0 %1130, %v584_v60  }
 0x104   : > { %v567_v61 = vpop.permute.xlu1 %566  ;;  %v569_v62 = vpop.permute.xlu0 %568 }
 0x105   : > { %v585_v14 = vmul.f32 %v567_v61, %v1273_v23  ;;  %v586_v63 = vmul.f32 %v569_v62, %v1276_v26  ;;  %v455_v23 = vrot.slane %v1315_v35, %v1339_v49  ;;  %v596_v62 = vrot.slane %v1315_v35, 6 }
 0x107   : > { %679 = vperm.xlu1 %1132, %v585_v14   ;;  %684 = vperm.xlu0 %1130, %v586_v63   ;;  %v598_v14 = vrot.slane %v1347_v53, 6 }
 0x108   : > { %v571_v18 = vpop.permute.xlu1 %570 }
 0x109   : > { %v587_v15 = vmul.f32 %v571_v18, %v1281_v28  ;;  %v599_v18 = vrot.slane %v1370_v24, 6 }
 0x10b   : > { %689 = vperm.xlu1 %1132, %v587_v15   ;;  %1133 = vset.pattern.permute.xlu0 %v1167_v12  ;;  %v612_v15 = vsub.f32 %v1315_v35, %v596_v62 }
 0x10c   : > { %757 = vperm.xlu0 %1133, %v1205_v2  }
 0x10f   : > { %1134 = vset.pattern.permute.xlu1 %v1167_v12  ;;  %v600_v12 = vrot.slane %v1384_v42, 6 }
 0x110   : > { %761 = vperm.xlu1 %1134, %v1211_v4   ;;  %769 = vperm.xlu0 %1133, %v1213_v5  }
 0x114   : > { %765 = vperm.xlu1 %1134, %v1207_v3   ;;  %777 = vperm.xlu0 %1133, %v1219_v7   ;;  %v467_v3 = vrot.slane %v1370_v24, %v1339_v49 }
 0x115   : > { %v1404_v19 = vpop.permute.xlu0 %281 }
 0x118   : > { %773 = vperm.xlu1 %1134, %v1217_v6   ;;  %785 = vperm.xlu0 %1133, %v1225_v9   ;;  %v471_v6 = vrot.slane %v1384_v42, %v1339_v49 }
 0x119   : > { %v278_v2 = vpop.permute.xlu1 %277 }
 0x11a   : > { %v328_v4 = vmax.f32 %v278_v2, %v311_v22  ;;  %v422_v26 = vpop.permute.xlu0 %421  ;;  %v614_v22 = vsub.f32 %v1347_v53, %v598_v14 }
 0x11b   : > { %v484_v5 = vmax.f32 %v422_v26, %v455_v23  ;;  %v1449_v23 = vld [vmem:[%s1293_s20 + $0x28] sm:$0xff]  ;;  %v628_v26 = vrot.slane %v612_v15, 1 }
 0x11c   : > { %v336_v7 = vsub.f32 %v256_v50, %v328_v4  ;;  %781 = vperm.xlu1 %1134, %v1223_v8   ;;  %v615_v4 = vsub.f32 %v1370_v24, %v599_v18 }
 0x11d   : > { %v492_v28 = vsub.f32 %v1333_v47, %v484_v5  ;;  %v616_v5 = vsub.f32 %v1384_v42, %v600_v12 }
 0x11e   : > { %v434_v13 = vpop.permute.xlu0 %433  ;;  %v438_v21 = vpop.permute.xlu1 %437  ;;  %v344_v47 = vmax.f32 %v336_v7, 0.0  ;;  %v1456_v7 = vld [vmem:[%s1293_s20 + $0x30] sm:$0xff] }
 0x11f   : > { %v487_v17 = vmax.f32 %v434_v13, %v467_v3  ;;  %v488_v25 = vmax.f32 %v438_v21, %v471_v6  ;;  %v500_v50 = vmax.f32 %v492_v28, 0.0  ;;  %v601_v3 = vrot.slane %v1449_v23, 6 }
 0x120   : > { %v630_v13 = vrot.slane %v614_v22, 1  ;;  %v631_v6 = vrot.slane %v615_v4, 1  ;;  %v644_v21 = vmul.f32 %v628_v26, %v612_v15  ;;  %v407_v62 = vrot.slane %v1456_v7, %v1323_v43 }
 0x121   : > { %v495_v20 = vsub.f32 %v1387_v46, %v487_v17  ;;  %v235_v46 = vrot.slane %v1370_v24, %v1296_v30  ;;  %v602_v17 = vrot.slane %v1456_v7, 6  ;;  %v247_v14 = vrot.slane %v1456_v7, %v1296_v30 }
 0x122   : > { %v1419_v9 = vpop.permute.xlu0 %445 }
 0x123   : > { %v503_v56 = vmax.f32 %v495_v20, 0.0  ;;  %v1437_v58 = vpop.permute.xlu1 %207 }
 0x127   : > { %v366_v33 = vpop.permute.xlu0 %365 }
 0x128   : > { %v416_v34 = vmin.f32 %v366_v33, %v399_v10  ;;  %v370_v59 = vpop.permute.xlu1 %369  ;;  %v1460_v10 = vld [vmem:[%s1293_s20 + $0x38] sm:$0xff]  ;;  %v617_v33 = vsub.f32 %v1449_v23, %v601_v3 }
 0x129   : > { %v323_v18 = vrot.slane %v1460_v10, %v1299_v31  ;;  %v483_v12 = vrot.slane %v1460_v10, %v1339_v49 }
 0x12a   : > { %v496_v36 = vsub.f32 %v416_v34, %v488_v25  ;;  %v632_v25 = vrot.slane %v616_v5, 1  ;;  %v315_v34 = vrot.slane %v1449_v23, %v1299_v31 }
 0x12b   : > { %v1423_v8 = vpop.permute.xlu0 %377 }
 0x12c   : > { %v504_v37 = vmax.f32 %v496_v36, 0.0  ;;  %v243_v36 = vrot.slane %v1449_v23, %v1296_v30 }
 0x12d   : > { %v442_v60 = vpop.permute.xlu1 %441 }
 0x12e   : > { %v1427_v39 = vmul.f32 %v504_v37, %v344_v47  ;;  %v479_v47 = vrot.slane %v1456_v7, %v1339_v49  ;;  %v403_v37 = vrot.slane %v1449_v23, %v1323_v43 }
 0x130   : > { %v183_v1 = vpop.permute.xlu0 %182  ;;  %v417_v26 = vmin.f32 %v370_v59, %v403_v37 }
 0x131   : > { %v252_v45 = vmin.f32 %v183_v1, %v223_v38  ;;  %v646_v38 = vmul.f32 %v630_v13, %v614_v22  ;;  %v618_v1 = vsub.f32 %v1456_v7, %v602_v17  ;;  %v490_v17 = vmax.f32 %v1419_v9, %v479_v47 }
 0x132   : > { %v286_v61 = vpop.permute.xlu1 %285 }
 0x133   : > { %v332_v11 = vsub.f32 %v252_v45, %v1325_v44  ;;  %v603_v45 = vrot.slane %v1460_v10, 6  ;;  %v703_v22 = vrot.slane %v646_v38, %v1296_v30 }
 0x134   : > { %v198_v48 = vpop.permute.xlu0 %197 }
 0x135   : > { %v340_v51 = vmax.f32 %v332_v11, 0.0  ;;  %v255_v52 = vmin.f32 %v198_v48, %v235_v46  ;;  %v411_v46 = vrot.slane %v1460_v10, %v1323_v43  ;;  %v475_v11 = vrot.slane %v1449_v23, %v1339_v49 }
 0x136   : > { %v257_v49 = vmin.f32 %v1437_v58, %v243_v36 }
 0x137   : > { %v335_v54 = vsub.f32 %v255_v52, %v1377_v40  ;;  %v1433_v55 = vmul.f32 %v500_v50, %v340_v51  ;;  %v374_v44 = vpop.permute.xlu1 %373  ;;  %v597_v40 = vrot.slane %v1304_v32, 6  ;;  %v647_v51 = vmul.f32 %v631_v6, %v615_v4 }
 0x138   : > { %v319_v52 = vrot.slane %v1456_v7, %v1299_v31  ;;  %v213_v15 = vpop.permute.xlu0 %212  ;;  %v619_v4 = vsub.f32 %v1460_v10, %v603_v45  ;;  %v489_v43 = vmax.f32 %v442_v60, %v475_v11  ;;  %v329_v45 = vmax.f32 %v1404_v19, %v315_v34 }
 0x139   : > { %v343_v57 = vmax.f32 %v335_v54, 0.0  ;;  %v613_v2 = vsub.f32 %v1304_v32, %v597_v40  ;;  %v695_v54 = vrot.slane %v644_v21, %v1296_v30  ;;  %v251_v40 = vrot.slane %v1460_v10, %v1296_v30 }
 0x13a   : > { %v707_v13 = vrot.slane %v647_v51, %v1296_v30  ;;  %v330_v21 = vmax.f32 %v286_v61, %v319_v52  ;;  %v258_v38 = vmin.f32 %v213_v15, %v247_v14  ;;  %v635_v37 = vrot.slane %v619_v4, 1 }
 0x13b   : > { %v1435_v0 = vmul.f32 %v503_v56, %v343_v57  ;;  %v629_v20 = vrot.slane %v613_v2, 1  ;;  %v648_v56 = vmul.f32 %v632_v25, %v616_v5  ;;  %v633_v57 = vrot.slane %v617_v33, 1 }
 0x13c   : > { %v1441_v63 = vpop.permute.xlu1 %217  ;;  %v418_v25 = vmin.f32 %v374_v44, %v407_v62  ;;  %v419_v11 = vmin.f32 %v1423_v8, %v411_v46  ;;  %v337_v44 = vsub.f32 %v257_v49, %v329_v45  ;;  %v338_v52 = vsub.f32 %v258_v38, %v330_v21 }
 0x13d   : > { %v645_v50 = vmul.f32 %v629_v20, %v613_v2  ;;  %v634_v2 = vrot.slane %v618_v1, 1  ;;  %v711_v31 = vrot.slane %v648_v56, %v1296_v30  ;;  %v649_v6 = vmul.f32 %v633_v57, %v617_v33 }
 0x13e   : > { %v259_v9 = vmin.f32 %v1441_v63, %v251_v40  ;;  %v498_v36 = vsub.f32 %v418_v25, %v490_v17  ;;  %v651_v57 = vmul.f32 %v635_v37, %v619_v4 }
 0x13f   : > { %v699_v3 = vrot.slane %v645_v50, %v1296_v30  ;;  %v650_v60 = vmul.f32 %v634_v2, %v618_v1  ;;  %v497_v50 = vsub.f32 %v417_v26, %v489_v43  ;;  %v715_v1 = vrot.slane %v649_v6, %v1296_v30 }
 0x140   : > { %v506_v15 = vmax.f32 %v498_v36, 0.0  ;;  %v723_v4 = vrot.slane %v651_v57, %v1296_v30 }
 0x141   : > { %v290_v28 = vpop.permute.xlu1 %289  ;;  %v719_v8 = vrot.slane %v650_v60, %v1296_v30  ;;  %v505_v46 = vmax.f32 %v497_v50, 0.0 }
 0x142   : > { %v331_v47 = vmax.f32 %v290_v28, %v323_v18  ;;  %v345_v18 = vmax.f32 %v337_v44, 0.0 }
 0x144   : > { %v339_v63 = vsub.f32 %v259_v9, %v331_v47 }
 0x146   : > { %v450_v48 = vpop.permute.xlu1 %449  ;;  %v347_v26 = vmax.f32 %v339_v63, 0.0 }
 0x147   : > { %v491_v33 = vmax.f32 %v450_v48, %v483_v12  ;;  %v1506_v48 = vsub.s32 4, %v1284_v29  ;;  %v346_v12 = vmax.f32 %v338_v52, 0.0 }
 0x149   : > { %v499_v62 = vsub.f32 %v419_v11, %v491_v33  ;;  %v795_v30 = vrot.slane %v1304_v32, %v1506_v48  ;;  %v799_v32 = vrot.slane %v1347_v53, %v1506_v48  ;;  %v811_v52 = vrot.slane %v1449_v23, %v1506_v48 }
 0x14b   : > { %v507_v17 = vmax.f32 %v499_v62, 0.0 }
 0x17a   : > { %v655_v5 = vpop.permute.xlu1 %654 }
 0x17b   : > { %v724_v20 = vadd.f32 %v695_v54, %v655_v5  ;;  %v513_v5 = vmul.f32 %v505_v46, %v345_v18  ;;  %v819_v46 = vrot.slane %v1460_v10, %v1506_v48 }
 0x17d   : > { %v732_v59 = vsub.f32 %v724_v20, %v1433_v55 }
 0x17e   : > { %v665_v51 = vpop.permute.xlu1 %664  ;;  %v660_v54 = vpop.permute.xlu0 %659 }
 0x17f   : > { %1135 = vrcp.f32 %v732_v59  ;;  %v726_v58 = vadd.f32 %v703_v22, %v665_v51  ;;  %v725_v61 = vadd.f32 %v699_v3, %v660_v54  ;;  %v515_v59 = vmul.f32 %v507_v17, %v347_v26 }
 0x181   : > { %v734_v19 = vsub.f32 %v726_v58, %v1381_v41  ;;  %v733_v34 = vsub.f32 %v725_v61, %v1362_v16 }
 0x182   : > { %v670_v28 = vpop.permute.xlu1 %669  ;;  %v675_v56 = vpop.permute.xlu0 %674 }
 0x183   : > { %1137 = vrcp.f32 %v734_v19  ;;  %v727_v14 = vadd.f32 %v707_v13, %v670_v28  ;;  %v728_v40 = vadd.f32 %v711_v31, %v675_v56  ;;  %v514_v13 = vmul.f32 %v506_v15, %v346_v12 }
 0x184   : > { %1139 = vrcp.f32 %v733_v34  ;;  %v791_v31 = vrot.slane %v1315_v35, %v1506_v48  ;;  %v807_v34 = vrot.slane %v1384_v42, %v1506_v48  ;;  %v885_v15 = vand.u32 127, %v220_v27 }
 0x185   : > { %v735_v22 = vsub.f32 %v727_v14, %v1435_v0  ;;  %v736_v2 = vsub.f32 %v728_v40, %v1427_v39 }
 0x186   : > { %v680_v43 = vpop.permute.xlu1 %679  ;;  %v685_v3 = vpop.permute.xlu0 %684 }
 0x187   : > { %1141 = vrcp.f32 %v735_v22  ;;  %v729_v20 = vadd.f32 %v715_v1, %v680_v43  ;;  %v730_v6 = vadd.f32 %v719_v8, %v685_v3 }
 0x188   : > { %1143 = vrcp.f32 %v736_v2  ;;  %v1168_v2 = vmov 0.0  }
 0x189   : > { %v1136_v49 = vpop.eup %1135  ;;  %v737_v21 = vsub.f32 %v729_v20, %v513_v5  ;;  %v738_v25 = vsub.f32 %v730_v6, %v514_v13 }
 0x18a   : > { %v690_v38 = vpop.permute.xlu1 %689  ;;  %v748_v45 = vmul.f32 %v1136_v49, %v1433_v55  ;;  %v803_v55 = vrot.slane %v1370_v24, %v1506_v48 }
 0x18b   : > { %1145 = vrcp.f32 %v737_v21  ;;  %v731_v60 = vadd.f32 %v723_v4, %v690_v38  ;;  %v758_v37 = vpop.permute.xlu0 %757 }
 0x18c   : > { %vm820_vm0 = vcmp.eq.f32.partialorder %v758_v37, %v791_v31  ;;  %1147 = vrcp.f32 %v738_v25 }
 0x18d   : > { %v1138_v11 = vpop.eup %1137  ;;  %v739_v50 = vsub.f32 %v731_v60, %v515_v59  ;;  %v828_v9 = vsel %vm820_vm0, %v748_v45, -1.0  ;;  %vm926_vm0 = vcmask 1045509  }
 0x18e   : > { %v1140_v47 = vpop.eup %1139  ;;  %836 = vmax.xlane.f32.xlu1 %v828_v9  ;;  %v750_v35 = vmul.f32 %v1138_v11, %v1381_v41 }
 0x18f   : > { %1149 = vrcp.f32 %v739_v50  ;;  %v762_v51 = vpop.permute.xlu1 %761  ;;  %v770_v54 = vpop.permute.xlu0 %769  ;;  %v749_v33 = vmul.f32 %v1140_v47, %v1362_v16 }
 0x190   : > { %vm821_vm1 = vcmp.eq.f32.partialorder %v762_v51, %v795_v30  ;;  %vm823_vm2 = vcmp.eq.f32.partialorder %v770_v54, %v803_v55 }
 0x191   : > { %v1142_v58 = vpop.eup %1141  ;;  %v829_v61 = vsel %vm821_vm1, %v749_v33, -1.0  ;;  %vm928_vm1 = vcmask 1046534  }
 0x192   : > { %v1144_v44 = vpop.eup %1143  ;;  %838 = vmax.xlane.f32.xlu0 %v829_v61  ;;  %v751_v36 = vmul.f32 %v1142_v58, %v1435_v0 }
 0x193   : > { %v766_v41 = vpop.permute.xlu1 %765  ;;  %v778_v19 = vpop.permute.xlu0 %777  ;;  %v752_v24 = vmul.f32 %v1144_v44, %v1427_v39  ;;  %v815_v39 = vrot.slane %v1456_v7, %v1506_v48  ;;  %v1534_v48 = vsub.s32 %v885_v15, %v1284_v29 }
 0x194   : > { %vm822_vm3 = vcmp.eq.f32.partialorder %v766_v41, %v799_v32  ;;  %v831_v16 = vsel %vm823_vm2, %v751_v36, -1.0  ;;  %vm825_vm4 = vcmp.eq.f32.partialorder %v778_v19, %v811_v52  ;;  %vm930_vm2 = vcmask 1047559  }
 0x195   : > { %v1146_v53 = vpop.eup %1145  ;;  %842 = vmax.xlane.f32.xlu1 %v831_v16  ;;  %v830_v1 = vsel %vm822_vm3, %v750_v35, -1.0 }
 0x196   : > { %840 = vmax.xlane.f32.xlu0 %v830_v1  ;;  %v753_v8 = vmul.f32 %v1146_v53, %v513_v5  ;;  %v1148_v63 = vpop.eup %1147 }
 0x197   : > { %v774_v0 = vpop.permute.xlu1 %773  ;;  %v786_v23 = vpop.permute.xlu0 %785  ;;  %v754_v14 = vmul.f32 %v1148_v63, %v514_v13 }
 0x198   : > { %vm824_vm5 = vcmp.eq.f32.partialorder %v774_v0, %v807_v34  ;;  %v833_v28 = vsel %vm825_vm4, %v753_v8, -1.0  ;;  %vm827_vm6 = vcmp.eq.f32.partialorder %v786_v23, %v819_v46 }
 0x199   : > { %v1150_v56 = vpop.eup %1149  ;;  %846 = vmax.xlane.f32.xlu1 %v833_v28  ;;  %v832_v42 = vsel %vm824_vm5, %v752_v24, -1.0 }
 0x19a   : > { %844 = vmax.xlane.f32.xlu0 %v832_v42  ;;  %v755_v57 = vmul.f32 %v1150_v56, %v515_v59 }
 0x19b   : > { %v782_v62 = vpop.permute.xlu1 %781 }
 0x19c   : > { %vm826_vm7 = vcmp.eq.f32.partialorder %v782_v62, %v815_v39  ;;  %v835_v40 = vsel %vm827_vm6, %v755_v57, -1.0 }
 0x19d   : > { %850 = vmax.xlane.f32.xlu1 %v835_v40  ;;  %v834_v18 = vsel %vm826_vm7, %v754_v14, -1.0  ;;  %vm933_vm7 = vcmask 64512  }
 0x19e   : > { %848 = vmax.xlane.f32.xlu0 %v834_v18 }
 0x21b   : > { %v837_v10 = vpop.xlane.xlu1 %836 }
 0x21c   : > { %v860_v12 = vsub.f32 1.0, %v837_v10  ;;  %vm852_vm8 = vcmp.ge.f32.partialorder %v837_v10, 0.0 }
 0x21d   : > { %v1082_v5 = vsel %vm852_vm8, 1.0, %v1168_v2 }
 0x21e   : > { %v868_v43 = vsel %vm852_vm8, %v860_v12, 0.0  ;;  %v964_v31 = vrot.slane %v1082_v5, %v1534_v48  ;;  %vm1012_vm8 = vcmask 57344  }
 0x21f   : > { %v839_v22 = vpop.xlane.xlu0 %838  ;;  %v889_v13 = vrot.slane %v868_v43, %v1534_v48 }
 0x220   : > { %vm853_vm9 = vcmp.ge.f32.partialorder %v839_v22, 0.0  ;;  %v861_v7 = vsub.f32 1.0, %v839_v22 }
 0x221   : > { %v1083_v26 = vsel %vm853_vm9, 1.0, %v1168_v2 }
 0x222   : > { %v869_v3 = vsel %vm853_vm9, %v861_v7, 0.0  ;;  %v843_v4 = vpop.xlane.xlu1 %842  ;;  %v968_v17 = vrot.slane %v1083_v26, %v1534_v48 }
 0x223   : > { %vm855_vm13 = vcmp.ge.f32.partialorder %v843_v4, 0.0  ;;  %v863_v27 = vsub.f32 1.0, %v843_v4  ;;  %v841_v20 = vpop.xlane.xlu0 %840  ;;  %v893_v6 = vrot.slane %v869_v3, %v1534_v48 }
 0x224   : > { %vm854_vm15 = vcmp.ge.f32.partialorder %v841_v20, 0.0  ;;  %v862_v29 = vsub.f32 1.0, %v841_v20  ;;  %v1085_v25 = vsel %vm855_vm13, 1.0, %v1168_v2  ;;  %v993_v60 = vsel %vm918_vm10, %v968_v17, %v964_v31 }
 0x225   : > { %v1084_v49 = vsel %vm854_vm15, 1.0, %v1168_v2  ;;  %v871_v21 = vsel %vm855_vm13, %v863_v27, 0.0  ;;  %v919_v50 = vsel %vm918_vm10, %v893_v6, %v889_v13  ;;  %v976_v51 = vrot.slane %v1085_v25, %v1534_v48 }
 0x226   : > { %v870_v38 = vsel %vm854_vm15, %v862_v29, 0.0  ;;  %v972_v45 = vrot.slane %v1084_v49, %v1534_v48  ;;  %v847_v59 = vpop.xlane.xlu1 %846  ;;  %v901_v35 = vrot.slane %v871_v21, %v1534_v48 }
 0x227   : > { %v897_v37 = vrot.slane %v870_v38, %v1534_v48  ;;  %vm857_vm3 = vcmp.ge.f32.partialorder %v847_v59, 0.0  ;;  %v865_v30 = vsub.f32 1.0, %v847_v59  ;;  %v845_v11 = vpop.xlane.xlu0 %844 }
 0x228   : > { %v994_v9 = vsel %vm920_vm11, %v972_v45, %v993_v60  ;;  %vm856_vm4 = vcmp.ge.f32.partialorder %v845_v11, 0.0  ;;  %v864_v47 = vsub.f32 1.0, %v845_v11  ;;  %v1087_v55 = vsel %vm857_vm3, 1.0, %v1168_v2 }
 0x229   : > { %v1086_v54 = vsel %vm856_vm4, 1.0, %v1168_v2  ;;  %v921_v33 = vsel %vm920_vm11, %v897_v37, %v919_v50  ;;  %v873_v32 = vsel %vm857_vm3, %v865_v30, 0.0  ;;  %v995_v19 = vsel %vm922_vm12, %v976_v51, %v994_v9 }
 0x22a   : > { %v872_v58 = vsel %vm856_vm4, %v864_v47, 0.0  ;;  %v980_v61 = vrot.slane %v1086_v54, %v1534_v48  ;;  %v851_v44 = vpop.xlane.xlu1 %850  ;;  %v984_v53 = vrot.slane %v1087_v55, %v1534_v48  ;;  %v923_v0 = vsel %vm922_vm12, %v901_v35, %v921_v33 }
 0x22b   : > { %v905_v36 = vrot.slane %v872_v58, %v1534_v48  ;;  %vm859_vm5 = vcmp.ge.f32.partialorder %v851_v44, 0.0  ;;  %v867_v41 = vsub.f32 1.0, %v851_v44  ;;  %v849_v52 = vpop.xlane.xlu0 %848  ;;  %v909_v46 = vrot.slane %v873_v32, %v1534_v48 }
 0x22c   : > { %v1089_v24 = vsel %vm859_vm5, 1.0, %v1168_v2  ;;  %vm858_vm6 = vcmp.ge.f32.partialorder %v849_v52, 0.0  ;;  %v866_v16 = vsub.f32 1.0, %v849_v52  ;;  %v996_v34 = vsel %vm924_vm14, %v980_v61, %v995_v19 }
 0x22d   : > { %v875_v1 = vsel %vm859_vm5, %v867_v41, 0.0  ;;  %v1088_v8 = vsel %vm858_vm6, 1.0, %v1168_v2  ;;  %v925_v28 = vsel %vm924_vm14, %v905_v36, %v923_v0  ;;  %v992_v39 = vrot.slane %v1089_v24, %v1534_v48 }
 0x22e   : > { %v874_v63 = vsel %vm858_vm6, %v866_v16, 0.0  ;;  %v988_v23 = vrot.slane %v1088_v8, %v1534_v48  ;;  %v997_v42 = vsel %vm926_vm0, %v984_v53, %v996_v34  ;;  %v917_v57 = vrot.slane %v875_v1, %v1534_v48 }
 0x22f   : > { %v913_v56 = vrot.slane %v874_v63, %v1534_v48  ;;  %v927_v14 = vsel %vm926_vm0, %v909_v46, %v925_v28 }
 0x230   : > { %v998_v62 = vsel %vm928_vm1, %v988_v23, %v997_v42 }
 0x231   : > { %v999_v40 = vsel %vm930_vm2, %v992_v39, %v998_v62  ;;  %v929_v18 = vsel %vm928_vm1, %v913_v56, %v927_v14 }
 0x232   : > { %v1001_v10 = vsel %vm933_vm7, %v999_v40, 0.0  ;;  %v931_v15 = vsel %vm930_vm2, %v917_v57, %v929_v18 }
 0x233   : > { %1002 = vadd.xlane.f32.xlu0 %v1001_v10  ;;  %v934_v12 = vsel %vm933_vm7, %v931_v15, 0.0 }
 0x234   : > { %935 = vadd.xlane.f32.xlu1 %v934_v12 }
 0x2c0   : > { %v1003_v22 = vpop.xlane.xlu0 %1002 }
 0x2c1   : > { %1151 = vrcp.f32 %v1003_v22  ;;  %v936_v2 = vpop.xlane.xlu1 %935 }
 0x2cb   : > { %v1152_v7 = vpop.eup %1151 }
 0x2cc   : > { %v1005_v26 = vmul.f32 %v1152_v7, %v936_v2 }
 0x2ce   : > { %v1010_v43 = vrot.slane %v1005_v26, %v1534_v48 }
 0x2d0   : > { %1013 = vst.msk [vmem:[%s163_s23] sm:$0x1] %vm1012_vm8, %v1010_v43 }
 0x2d1 PF: > { %s12_s9 = sadd.s32 1, %s1159_s9  }
 0x2d2   : > { %p9_p5 = scmp.ge.s32.totalorder %s12_s9, 4  }
 0x2d4   :  { %11 = sbr.rel (!%p9_p5) target bundleno = 1 (0x1), region = 61 }

</bundles_post_ra>
